<compile_context>
chip_gen: v7x
topology: tpu7x:2x2x1
jax: 0.10.0
libtpu: 0.0.40
codegen_flags: <defaults>
</compile_context>

<pallas_src>
import jax
import jax.numpy as jnp
from jax.experimental import pallas as pl
from jax.experimental.pallas import tpu as pltpu


def quantnet_kernel(scales_ref, wq_ref, b_ref, patch_ref, o_ref):
    # scales_ref (SMEM): [s_in * s_w, 1 / s_out, s_out]
    s_deq = scales_ref[0]
    inv_s_out = scales_ref[1]
    s_out = scales_ref[2]

    # Quantized conv as an MXU matmul on integer-valued bf16 operands
    # ([Cout, K] @ [K, tm] -> [Cout, tm]); products/sums are exact in f32.
    acc = jnp.dot(wq_ref[...], patch_ref[...], preferred_element_type=jnp.float32)

    # dequant + float bias + ReLU activation
    y = jnp.maximum(acc * s_deq + b_ref[...], 0.0)

    # out_quant: QuantIdentity(return_quant_tensor=False) -> dequantized float
    o_ref[...] = jnp.clip(jnp.round(y * inv_s_out), -128.0, 127.0) * s_out


def _choose_tile(M, max_tm=2048):
    """Largest 128-multiple dividing M (capped), preferring >=2 grid steps (megacore)."""
    divisors = [t for t in range(128, min(max_tm, M) + 1, 128) if M % t == 0]
    assert divisors, "M must be a multiple of 128 for this synthetic setup"
    two_step = [t for t in divisors if M // t >= 2]
    return max(two_step) if two_step else max(divisors)


def quantnet_forward(x, w, b, s_in, s_w, s_out):
    """x: [N, Cin, H, W] (NCHW), w: [Cout, Cin, kh, kw], b: [Cout]."""
    N, Cin, H, W = x.shape
    Cout, _, kh, kw = w.shape
    ph, pw = kh // 2, kw // 2
    K = Cin * kh * kw
    M = N * H * W

    # --- hoisted fake-quant (done once, before im2col) ---
    # in_quant: int8, per-tensor, symmetric, round-half-even (matches torch.round)
    xq = jnp.clip(jnp.round(x / s_in), -128.0, 127.0)          # integer-valued
    # weight quant: Int8WeightPerTensorFloat (narrow range [-127, 127])
    wq = jnp.clip(jnp.round(w / s_w), -127.0, 127.0)

    # --- glue: im2col on the already-quantized input (stride=1, "same" padding) ---
    xp = jnp.pad(xq, ((0, 0), (0, 0), (ph, ph), (pw, pw)))
    cols = []
    for i in range(kh):
        for j in range(kw):
            cols.append(xp[:, :, i:i + H, j:j + W])            # [N, Cin, H, W]
    patches = jnp.stack(cols, axis=2)                          # [N, Cin, kh*kw, H, W]
    # -> [K, M] (K ordered (Cin, kh, kw); M ordered (N, H, W)), integer-valued bf16
    patches_t = patches.transpose(1, 2, 0, 3, 4).reshape(K, M).astype(jnp.bfloat16)

    wq_mat = wq.reshape(Cout, K).astype(jnp.bfloat16)          # [Cout, K], same K order
    b_mat = b.reshape(Cout, 1).astype(jnp.float32)
    scales = jnp.array([s_in * s_w, 1.0 / s_out, s_out], dtype=jnp.float32)

    tm = _choose_tile(M)

    out_t = pl.pallas_call(
        quantnet_kernel,
        out_shape=jax.ShapeDtypeStruct((Cout, M), jnp.float32),
        grid=(M // tm,),
        in_specs=[
            pl.BlockSpec(memory_space=pltpu.SMEM),             # scales (scalars)
            pl.BlockSpec((Cout, K), lambda i: (0, 0)),         # quantized weights (resident)
            pl.BlockSpec((Cout, 1), lambda i: (0, 0)),         # bias (resident)
            pl.BlockSpec((K, tm), lambda i: (0, i)),           # quantized patch columns
        ],
        out_specs=pl.BlockSpec((Cout, tm), lambda i: (0, i)),  # lane-dense [Cout, tm] store
        compiler_params=pltpu.CompilerParams(
            dimension_semantics=("parallel",)),
    )(scales, wq_mat, b_mat, patches_t)

    # [Cout, N*H*W] -> NCHW
    return out_t.reshape(Cout, N, H, W).transpose(1, 0, 2, 3)


def quantnet_reference(x, w, b, s_in, s_w, s_out):
    """Pure-JAX reference of the same fake-quantized forward pass."""
    xq = jnp.clip(jnp.round(x / s_in), -128.0, 127.0) * s_in
    wq = jnp.clip(jnp.round(w / s_w), -127.0, 127.0) * s_w
    y = jax.lax.conv_general_dilated(
        xq, wq, window_strides=(1, 1), padding="SAME",
        dimension_numbers=("NCHW", "OIHW", "NCHW")) + b[None, :, None, None]
    y = jnp.maximum(y, 0.0)
    return jnp.clip(jnp.round(y / s_out), -128.0, 127.0) * s_out


if __name__ == "__main__":
    key = jax.random.PRNGKey(0)
    kx, kw_, kb = jax.random.split(key, 3)

    N, Cin, H, W = 2, 4, 16, 16
    Cout, ksz = 8, 3

    x = jax.random.normal(kx, (N, Cin, H, W), dtype=jnp.float32)
    w = jax.random.normal(kw_, (Cout, Cin, ksz, ksz), dtype=jnp.float32) * 0.1
    b = jax.random.normal(kb, (Cout,), dtype=jnp.float32) * 0.01

    # Deterministic "calibration-style" scale init (brevitas learns/calibrates
    # these; here they are fixed scalars derived once from the tensors).
    s_in = float(jnp.max(jnp.abs(x)) / 127.0)
    s_w = float(jnp.max(jnp.abs(w)) / 127.0)
    s_out = 0.05

    y = quantnet_forward(x, w, b, s_in, s_w, s_out)
    jax.block_until_ready(y)

    y_ref = quantnet_reference(x, w, b, s_in, s_w, s_out)
    max_err = float(jnp.max(jnp.abs(y - y_ref)))
    # allow at most one output quantization step of disagreement (rounding at .5 boundaries)
    assert max_err <= s_out + 1e-3, f"mismatch vs reference: {max_err}"
    assert y.shape == (N, Cout, H, W)

    print("KERNEL_OK")
</pallas_src>

<mosaic_0001>
module attributes {stable_mosaic.version = 11 : i64} {
  func.func @quantnet_kernel(%arg0: i32, %arg1: memref<3xf32, #tpu.memory_space<smem>>, %arg2: memref<8x36xbf16, #tpu.memory_space<vmem>>, %arg3: memref<8x1xf32, #tpu.memory_space<vmem>>, %arg4: memref<36x256xbf16, #tpu.memory_space<vmem>>, %arg5: memref<8x256xf32, #tpu.memory_space<vmem>>) attributes {dimension_semantics = [#tpu.dimension_semantics<parallel>], iteration_bounds = array<i64: 2>, scalar_prefetch = 0 : i64, scratch_operands = 0 : i64, tpu.core_type = #tpu.core_type<tc>, window_params = [{transform_indices = @transform_0, window_bounds = array<i64: 3>}, {pipeline_mode = #tpu.pipeline_mode<synchronous>, transform_indices = @transform_1, window_bounds = array<i64: 8, 36>}, {pipeline_mode = #tpu.pipeline_mode<synchronous>, transform_indices = @transform_2, window_bounds = array<i64: 8, 1>}, {transform_indices = @transform_3, window_bounds = array<i64: 36, 256>}, {transform_indices = @transform_4, window_bounds = array<i64: 8, 256>}]} {
    %c0 = arith.constant 0 : index
    %0 = memref.load %arg1[%c0] : memref<3xf32, #tpu.memory_space<smem>>
    %c1 = arith.constant 1 : index
    %1 = memref.load %arg1[%c1] : memref<3xf32, #tpu.memory_space<smem>>
    %c2 = arith.constant 2 : index
    %2 = memref.load %arg1[%c2] : memref<3xf32, #tpu.memory_space<smem>>
    %c0_0 = arith.constant 0 : index
    %c0_1 = arith.constant 0 : index
    %3 = vector.load %arg2[%c0_0, %c0_1] : memref<8x36xbf16, #tpu.memory_space<vmem>>, vector<8x36xbf16>
    %c0_2 = arith.constant 0 : index
    %c0_3 = arith.constant 0 : index
    %4 = vector.load %arg4[%c0_2, %c0_3] : memref<36x256xbf16, #tpu.memory_space<vmem>>, vector<36x256xbf16>
    %cst = arith.constant dense<0.000000e+00> : vector<8x256xf32>
    %5 = tpu.matmul %3, %4, %cst {dimension_numbers = #tpu.dot_dimension_numbers<[1], [0], [0], [1], [0, 0, 1, 1], [], []>} : vector<8x36xbf16>, vector<36x256xbf16>, vector<8x256xf32> -> vector<8x256xf32>
    %6 = vector.broadcast %0 : f32 to vector<8x256xf32>
    %7 = arith.mulf %5, %6 : vector<8x256xf32>
    %c0_4 = arith.constant 0 : index
    %c0_5 = arith.constant 0 : index
    %8 = vector.load %arg3[%c0_4, %c0_5] : memref<8x1xf32, #tpu.memory_space<vmem>>, vector<8x1xf32>
    %9 = vector.broadcast %8 : vector<8x1xf32> to vector<8x256xf32>
    %10 = arith.addf %7, %9 : vector<8x256xf32>
    %cst_6 = arith.constant 0.000000e+00 : f32
    %11 = vector.broadcast %cst_6 : f32 to vector<8x256xf32>
    %12 = arith.maximumf %10, %11 : vector<8x256xf32>
    %13 = vector.broadcast %1 : f32 to vector<8x256xf32>
    %14 = arith.mulf %12, %13 : vector<8x256xf32>
    %15 = math.roundeven %14 : vector<8x256xf32>
    %cst_7 = arith.constant -1.280000e+02 : f32
    %cst_8 = arith.constant 1.270000e+02 : f32
    %16 = vector.broadcast %cst_7 : f32 to vector<8x256xf32>
    %17 = arith.maximumf %16, %15 : vector<8x256xf32>
    %18 = vector.broadcast %cst_8 : f32 to vector<8x256xf32>
    %19 = arith.minimumf %18, %17 : vector<8x256xf32>
    %20 = vector.broadcast %2 : f32 to vector<8x256xf32>
    %21 = arith.mulf %19, %20 : vector<8x256xf32>
    %c0_9 = arith.constant 0 : index
    %c0_10 = arith.constant 0 : index
    %22 = vector.load %arg5[%c0_9, %c0_10] : memref<8x256xf32, #tpu.memory_space<vmem>>, vector<8x256xf32>
    tpu.vector_store %arg5[%c0_9, %c0_10], %21 {strides = array<i32>} : memref<8x256xf32, #tpu.memory_space<vmem>>, vector<8x256xf32>,
    return
  }
  func.func @transform_0(%arg0: i32) -> i32 {
    %c0_i32 = arith.constant 0 : i32
    %c0_i32_0 = arith.constant 0 : i32
    return %c0_i32 : i32
  }
  func.func @transform_1(%arg0: i32) -> (i32, i32) {
    %c0_i32 = arith.constant 0 : i32
    %c0_i32_0 = arith.constant 0 : i32
    %c0_i32_1 = arith.constant 0 : i32
    return %c0_i32, %c0_i32_0 : i32, i32
  }
  func.func @transform_2(%arg0: i32) -> (i32, i32) {
    %c0_i32 = arith.constant 0 : i32
    %c0_i32_0 = arith.constant 0 : i32
    %c0_i32_1 = arith.constant 0 : i32
    return %c0_i32, %c0_i32_0 : i32, i32
  }
  func.func @transform_3(%arg0: i32) -> (i32, i32) {
    %c0_i32 = arith.constant 0 : i32
    %c0_i32_0 = arith.constant 0 : i32
    return %c0_i32, %arg0 : i32, i32
  }
  func.func @transform_4(%arg0: i32) -> (i32, i32) {
    %c0_i32 = arith.constant 0 : i32
    %c0_i32_0 = arith.constant 0 : i32
    return %c0_i32, %arg0 : i32, i32
  }
}

</mosaic_0001>

<bundles_post_ra>
// kernel: tpu_custom_call.1
= control target key start
LH: loop header
LB: loop body
LE: loop exit
PB: predicated region body
PF: predicated region fallthrough
CT: control target
= control target key end

     0   :  { %9 = vsyncpa [#allocation5], 0  ;;  %s886_s0 = inlined_call_operand.vmem [shape: f32[3], index: 0, kind: input, shape index: {}]   ;;  %s887_s1 = inlined_call_operand.vmem [shape: bf16[8,36], index: 1, kind: input, shape index: {}]   ;;  %s888_s2 = inlined_call_operand.vmem [shape: f32[8,1], index: 2, kind: input, shape index: {}]   ;;  %s889_s3 = inlined_call_operand.hbm [shape: bf16[36,512], index: 3, kind: input, shape index: {}]   ;;  %s890_s4 = inlined_call_operand.hbm [shape: f32[8,512], index: 4, kind: output, shape index: {}]  }
   0x1   :  { %10 = vsyncpa [#allocation3], 0 }
   0x2   :  { %12 = vsyncpa [#allocation3 + $0x1], 0 }
   0x3   :  { %13 = vsyncpa [#allocation4], 0 }
   0x4   :  { %15 = vsyncpa [#allocation4 + $0x1], 0  ;;  %s692_s15 = smov 0   ;;  %s694_s16 = smov 0  }
   0x5   :  { %s696_s17 = smov 0   ;;  %s698_s18 = smov 0  }
   0x6 LB: > { %s713_s19 = sadd.s32 4294967295, %s658_s18   ;;  %s443_s20 = sadd.s32 4294967294, %s658_s18   ;;  %s658_s18 = sphi %s698_s18, %s910_s18   ;;  %s654_s17 = sphi %s696_s17, %s909_s17   ;;  %s650_s16 = sphi %s694_s16, %s908_s16   ;;  %s646_s15 = sphi %s692_s15, %s907_s15  }
   0x7   : > { %s717_s21 = sadd.s32 1, %s658_s18   ;;  %s91_s22 = sadd.s32 1, %s654_s17 }
   0x8   : > { %s88_s23 = ssub.s32 %s658_s18, %s717_s21  ;;  %p98_p0 = scmp.ne.s32.totalorder %s654_s17, %s650_s16 }
   0x9   : > { %p89_p1 = scmp.eq.s32.totalorder %s88_s23, 0  ;;  %p99_p2 = scmp.eq.s32.totalorder %s658_s18, 0 }
   0xa   : > { %p104_p3 = scmp.ne.s32.totalorder %s650_s16, %s646_s15  ;;  %p892_p4 = scmp.eq.s32.totalorder %s713_s19, 0 }
   0xb   : > { %s729_s24 = scalar_select %p89_p1, %s654_s17, %s91_s22  }
   0xc   : > { %p731_p5 = por %p99_p2, %p98_p0  ;;  %p737_p6 = por %p892_p4, %p104_p3 }
   0xd   : > { %p128_p7 = scmp.eq.s32.totalorder %s713_s19, 1  ;;  %p134_p8 = scmp.eq.s32.totalorder %s443_s20, 1 }
   0xe   : > { %s895_s26 = scalar_select %p737_p6, 1, 0 }
   0xf   : > { %p444_p9 = scmp.ge.s32.totalorder %s658_s18, 1  ;;  %p141_p10 = scmp.lt.s32.totalorder %s658_s18, 3 }
  0x10   : > { %p744_p11 = por %p128_p7, %p98_p0  ;;  %p748_p12 = por %p134_p8, %p104_p3 }
  0x11   : > { %p752_p13 = pnand %p444_p9, %p141_p10  ;;  %s154_s6 = sshll.u32 %s886_s0, 4  ;;  %s155_s6 = int_to_ptr.vmem [resolvable:$true] %s154_s6 }
  0x12   : > { %s896_s27 = scalar_select %p744_p11, 1, 0 }
  0x13   : > { %s897_s28 = scalar_select %p748_p12, 1, 0 }
  0x14   : > { %p481_p1 = pneg %p752_p13  ;;  %p494_p2 = scmp.lt.s32.totalorder %s658_s18, 2 }
  0x15   : > { %s171_s8 = sand.u32 1, %s654_s17   ;;  %s543_s11 = scalar_lea.vmem %s155_s6, 16 }
  0x16   : > { %p765_p7 = pnand %p481_p1, %p892_p4  ;;  %p772_p3 = pnand %p494_p2, %p731_p5 }
  0x17   : > { %s469_s10 = smul.u32 40, %s171_s8  ;;  %p544_p8 = scmp.ne.s32.totalorder %s155_s6, %s543_s11 }
  0x18   : > { %p545_p9 = pneg %p765_p7  ;;  %p551_p12 = scmp.lt.s32.totalorder %s155_s6, %s155_s6 }
  0x19   : > { %p552_p11 = scmp.lt.s32.totalorder %s543_s11, %s543_s11 }
  0x1a   : > { %p546_p10 = pnand %p545_p9, %p544_p8 }
  0x1b   : > { %p553_p1 = por %p552_p11, %p551_p12 }
  0x1c   : > { %p547_p0 = pneg %p546_p10 }
  0x1e   : > { %p554_p4 = pnand %p553_p1, %p547_p0 }
  0x20   : > { %557 = shalt.err (!%p554_p4)
}
  0x21   : > { %s660_s12 = smov [#allocation2]   ;;  %s467_s13 = sshll.u32 %s658_s18, 7 }
  0x22   : > { %484 = dma.vmem_to_smem (!%p765_p7), %s155_s6, 16, %s660_s12, [#allocation5]  }
  0x23   : > { %s175_s14 = scalar_lea.vmem [#allocation6], %s469_s10  ;;  %s784_s25 = scalar_lea.hbm %s889_s3, %s467_s13 }
  0x24   : > { %s182_s20 = sshll.u32 %s175_s14, 4  ;;  %s788_s30 = scalar_lea.sflag [#allocation3], %s171_s8  ;;  %s786_s20 = int_to_ptr.vmem [resolvable:$true] %s182_s20 }
  0x25   : > { %s558_s5 = scalar_lea.hbm %s784_s25, 640  ;;  %p560_p5 = pneg %p772_p3 }
  0x26   : > { %p559_p4 = scmp.ne.s32.totalorder %s784_s25, %s558_s5  ;;  %s563_s10 = scalar_lea.hbm %s889_s3, 1280 }
  0x27   : > { %p564_p0 = scmp.lt.u32.totalorder %s784_s25, %s889_s3  ;;  %p565_p2 = scmp.lt.u32.totalorder %s563_s10, %s558_s5 }
  0x28   : > { %p561_p11 = pnand %p560_p5, %p559_p4  ;;  %p567_p8 = scmp.lt.u32.totalorder %s558_s5, %s784_s25 }
  0x29   : > { %p566_p7 = por %p565_p2, %p564_p0 }
  0x2a   : > { %p562_p12 = pneg %p561_p11 }
  0x2b   : > { %p568_p9 = por %p567_p8, %p566_p7 }
  0x2d   : > { %p569_p10 = pnand %p568_p9, %p562_p12 }
  0x2f   : > { %572 = shalt.err (!%p569_p10)
}
  0x30   : > { %s573_s8 = scalar_lea.vmem %s786_s20, 640  ;;  %s661_s13 = smov [#allocation6]  }
  0x31   : > { %p574_p1 = scmp.ne.s32.totalorder %s786_s20, %s573_s8  ;;  %s578_s14 = sshll.u32 %s661_s13, 4  ;;  %s579_s14 = int_to_ptr.vmem [resolvable:$false] %s578_s14 }
  0x32   : > { %s580_s22 = scalar_lea.vmem %s579_s14, 1280  ;;  %p581_p6 = scmp.lt.s32.totalorder %s786_s20, %s579_s14 }
  0x33   : > { %p576_p4 = pnand %p574_p1, %p560_p5  ;;  %p582_p0 = scmp.lt.s32.totalorder %s580_s22, %s573_s8 }
  0x35   : > { %p577_p11 = pneg %p576_p4  ;;  %p583_p2 = por %p582_p0, %p581_p6 }
  0x37   : > { %p584_p7 = pnand %p583_p2, %p577_p11 }
  0x39   : > { %587 = shalt.err (!%p584_p7)
}
  0x3a   : > { %s662_s23 = smov 256   ;;  %s663_s5 = smov 128  }
  0x3b   : > { %s664_s6 = smov 8   ;;  %194 = sbr.rel (%p752_p13) target bundleno = 331 (0x14b), region = 36 }
  0x3c   : > { %488 = dma.hbm_to_vmem [thread:$0]  (!%p772_p3), %s784_s25, 640, %s786_s20, %s788_s30, %s662_s23, %s663_s5, %s664_s6  }
  0x3d   : > { %p901_p5 = scmp.eq.s32.totalorder (!%p752_p13), %s713_s19, 0 }
  0x42   : > { %633 = dma.done.wait (%p901_p5), [#allocation5], 16   ;;  %p902_p12 = pmov %p901_p5 }
  0x43   : > { %s823_s7 = sand.u32 1, %s650_s16   ;;  %p903_p6 = scmp.ne.s32.totalorder %s895_s26, 0 }
  0x44   : > { %635 = vsyncadd (%p902_p12), [#allocation5], 4294967280  ;;  %s470_s10 = smul.u32 40, %s823_s7  ;;  %s201_s11 = scalar_lea.sflag [#allocation3], %s823_s7 }
  0x46   : > { %s204_s12 = scalar_lea.vmem [#allocation6], %s470_s10 }
  0x47   : > { %637 = dma.done.wait (%p903_p6), %s201_s11, 640  }
  0x48   : > { %639 = vsyncadd (%p903_p6), %s201_s11, 4294966656 }
  0x49   : > { %209 = sfence }
  0x4a   : > { %v535_v0 = vld [vmem:[%s204_s12 + $0x4] ss:$8 sps:$4 sm:$0xff]   ;;  %v537_v1 = vld [vmem:[%s204_s12] ss:$8 sps:$4 sm:$0xff]   ;;  %v665_v2 = vmov 0   ;;  %vm271_vm0 = vcmask 1041408  }
  0x4b   : > { %310 = vmatprep.mubr.bf16.mxu0 %v665_v2  ;;  %534 = vset.pattern.permute.xlu0 %v665_v2  ;;  %v538_v3 = vld [vmem:[%s204_s12 + $0x14] ss:$8 sps:$4 sm:$0xff]   ;;  %v241_v4 = vld [vmem:[%s204_s12 + $0x20] sm:$0x33]  ;;  %v540_v5 = vld [vmem:[%s204_s12 + $0x10] ss:$8 sps:$4 sm:$0xff]  }
  0x4c   : > { %278 = vmatprep.subr.bf16.mxu0 %v535_v0  ;;  %v322_v6 = vld [vmem:[%s888_s2] sm:$0xff]  ;;  %v459_v7 = vcombine.high %v241_v4, %v241_v4  ;;  %v458_v8 = vcombine.low %v241_v4, %v241_v4  ;;  %vm267_vm1 = vcmask 293888   ;;  %s233_s25 = sld [smem:[#allocation2]]  ;;  %s452_s30 = sld [smem:[#allocation2 + $0x1]] }
  0x4d   : > { %279 = vmatpush1.bf16.msra.mxu0 %v537_v1  ;;  %325 = vperm.xlu0 %534, %v322_v6   ;;  %v236_v10 = vld [vmem:[%s887_s1] sm:$0xf]  ;;  %s453_s8 = sld [smem:[#allocation2 + $0x2]]  ;;  %s451_s13 = sshll.u32 %s823_s7, 4 }
  0x4e   : > { %280 = vmatprep.subr.bf16.mxu0 %v538_v3  ;;  %v273_v9 = vsel %vm271_vm0, %v458_v8, 0  ;;  %s468_s14 = sshll.u32 %s713_s19, 8  ;;  %s229_s22 = scalar_lea.vmem [#allocation7], %s451_s13 }
  0x4f   : > { %s361_s23 = sshll.u32 %s229_s22, 4  ;;  %s842_s10 = scalar_lea.hbm %s890_s4, %s468_s14  ;;  %s844_s23 = int_to_ptr.vmem [resolvable:$true] %s361_s23 }
  0x50   : > { %s347_s11 = scalar_lea.sflag [#allocation4], %s823_s7  ;;  %s588_s12 = scalar_lea.vmem %s844_s23, 256 }
  0x51   : > { %281 = vmatpush1.bf16.msra.mxu0 %v540_v5  ;;  %p589_p13 = scmp.ne.s32.totalorder %s844_s23, %s588_s12  ;;  %p904_p3 = scmp.ne.s32.totalorder %s896_s27, 0 }
  0x52   : > { %460 = vmatprep.subr.msk.bf16.mxu0 %vm271_vm0, %v459_v7  ;;  %v319_v11 = vstv %s233_s25  ;;  %v332_v21 = vstv %s452_s30  ;;  %s666_s19 = smov [#allocation7]  }
  0x53   : > { %v341_v30 = vstv %s453_s8  ;;  %p590_p8 = pnand %p589_p13, %p904_p3  ;;  %s592_s29 = sshll.u32 %s666_s19, 4  ;;  %s593_s29 = int_to_ptr.vmem [resolvable:$false] %s592_s29 }
  0x54   : > { %s594_s9 = scalar_lea.vmem %s593_s29, 512  ;;  %p595_p10 = scmp.lt.s32.totalorder %s844_s23, %s593_s29 }
  0x55   : > { %283 = vmatpush1.bf16.msra.mxu0 %v273_v9  ;;  %p591_p9 = pneg %p590_p8  ;;  %p596_p1 = scmp.lt.s32.totalorder %s594_s9, %s588_s12 }
  0x57   : > { %p597_p4 = por %p596_p1, %p595_p10 }
  0x58   : > { %461 = vmatmul.mubr.msk.bf16.vlgmr.msra.gmra.mrb[0].mxu0 %vm267_vm1, %v236_v10 }
  0x59   : > { %p598_p11 = pnand %p597_p4, %p591_p9 }
  0xcc   : > { %v326_v13 = vpop.permute.xlu0 %325 }
 0x12b   : > { %v312_v12 = vpop.f32.mrb[0].mxu0 }
 0x12c   : > { %v320_v14 = vmul.f32 %v319_v11, %v312_v12  ;;  %v314_v15 = vpop.f32.mrb[1].mxu0 }
 0x12d   : > { %v321_v16 = vmul.f32 %v319_v11, %v314_v15  ;;  %v316_v17 = vpop.f32.mrb[2].mxu0 }
 0x12e   : > { %v328_v18 = vadd.f32 %v326_v13, %v320_v14  ;;  %v317_v19 = vpop.f32.mrb[3].mxu0 }
 0x12f   : > { %v329_v20 = vadd.f32 %v326_v13, %v321_v16 }
 0x130   : > { %v330_v22 = vmax.f32 %v328_v18, 0.0 }
 0x131   : > { %v331_v23 = vmax.f32 %v329_v20, 0.0 }
 0x132   : > { %v333_v24 = vmul.f32 %v332_v21, %v330_v22 }
 0x133   : > { %v334_v25 = vmul.f32 %v332_v21, %v331_v23 }
 0x134   : > { %v471_v26 = vround.rtne.f32 %v333_v24 }
 0x135   : > { %v472_v27 = vround.rtne.f32 %v334_v25 }
 0x136   : > { %v337_v28 = vmax.f32 %v471_v26, -128.0 }
 0x137   : > { %v338_v29 = vmax.f32 %v472_v27, -128.0 }
 0x138   : > { %v339_v31 = vmin.f32 %v337_v28, 127.0 }
 0x139   : > { %v340_v32 = vmin.f32 %v338_v29, 127.0 }
 0x13a   : > { %v342_v33 = vmul.f32 %v341_v30, %v339_v31 }
 0x13b   : > { %v343_v34 = vmul.f32 %v341_v30, %v340_v32 }
 0x13c   : > { %344 = vst [vmem:[%s229_s22] sm:$0xff] %v342_v33 }
 0x13d   : > { %345 = vst [vmem:[%s229_s22 + $0x8] sm:$0xff] %v343_v34 }
 0x13e   : > { %601 = shalt.err (!%p598_p11)
}
 0x13f   : > { %s602_s7 = scalar_lea.hbm %s842_s10, 256  ;;  %s606_s25 = scalar_lea.hbm %s890_s4, 512 }
 0x140   : > { %p603_p0 = scmp.ne.s32.totalorder %s842_s10, %s602_s7  ;;  %p607_p5 = scmp.lt.u32.totalorder %s842_s10, %s890_s4 }
 0x141   : > { %p608_p12 = scmp.lt.u32.totalorder %s606_s25, %s602_s7  ;;  %p610_p13 = scmp.lt.u32.totalorder %s602_s7, %s842_s10 }
 0x142   : > { %p604_p2 = pnand %p603_p0, %p904_p3 }
 0x143   : > { %p609_p6 = por %p608_p12, %p607_p5 }
 0x144   : > { %p605_p7 = pneg %p604_p2 }
 0x145   : > { %p611_p8 = por %p610_p13, %p609_p6 }
 0x147   : > { %p612_p9 = pnand %p611_p8, %p605_p7 }
 0x149   : > { %615 = shalt.err (!%p612_p9)
}
 0x14a   : > { %479 = dma.vmem_to_hbm [thread:$0]  (%p904_p3), %s844_s23, 256, %s842_s10, %s347_s11  }
 0x14b PF: > { %s373_s13 = sand.u32 1, %s646_s15   ;;  %p905_p10 = scmp.ne.s32.totalorder %s897_s28, 0 }
 0x14c   : > { %p906_p1 = scmp.ge.s32.totalorder %s658_s18, 2  ;;  %s374_s14 = scalar_lea.sflag [#allocation4], %s373_s13 }
 0x14e   : > { %p490_p4 = pnand %p906_p1, %p905_p10 }
 0x150   : > { %641 = dma.done.wait (!%p490_p4), %s374_s14, 256  }
 0x151   : > { %643 = vsyncadd (!%p490_p4), %s374_s14, 4294967040  ;;  %p18_p11 = scmp.ge.s32.totalorder %s717_s21, 4   ;;  %s907_s15 = smov %s650_s16 }
 0x152   : > { %s908_s16 = smov %s654_s17  ;;  %s909_s17 = smov %s729_s24 }
 0x153   : > { %s910_s18 = smov %s717_s21  ;;  %20 = sbr.rel (!%p18_p11) target bundleno = 6 (0x6), region = 86 }
 0x15a   :  { %379 = vsyncpa [#allocation3], 1 }
 0x15b   :  { %381 = vsyncpa [#allocation3 + $0x1], 1 }
 0x15c   :  { %382 = vsyncpa [#allocation4], 1 }
 0x15d   :  { %384 = vsyncpa [#allocation4 + $0x1], 1 }
 0x15e   :  { %385 = vsyncpa [#allocation5], 1 }
 0x15f   :  { %387 = vsyncpa [#allocation5 + $0x1], 1 }

</bundles_post_ra>
